<compile_context>
chip_gen: v5e
topology: v5e:2x2
jax: 0.10.0
libtpu: 0.0.40
codegen_flags: <defaults>
</compile_context>

<pallas_src>
import jax
import jax.numpy as jnp
from jax.experimental import pallas as pl
from jax.experimental.pallas import tpu as pltpu


def _round_up(v, m):
    return (v + m - 1) // m * m


def _mlp_kernel(x_ref, w1_ref, b1_ref, w2_ref, b2_ref, w3_ref, b3_ref, o_ref):
    # Fused hot path: three MXU matmuls (bf16 operands, f32 accumulation) with
    # f32 bias + ReLU epilogues on the VPU; everything stays VMEM-resident.
    x = x_ref[...].astype(jnp.bfloat16)                                # [tb, N]

    h1 = jnp.dot(x, w1_ref[...], preferred_element_type=jnp.float32) + b1_ref[...]
    h1 = jnp.maximum(h1, 0.0).astype(jnp.bfloat16)                     # [tb, Hp]

    h2 = jnp.dot(h1, w2_ref[...], preferred_element_type=jnp.float32) + b2_ref[...]
    h2 = jnp.maximum(h2, 0.0).astype(jnp.bfloat16)                     # [tb, Hp]

    out = jnp.dot(h2, w3_ref[...], preferred_element_type=jnp.float32) + b3_ref[...]
    o_ref[...] = out.astype(o_ref.dtype)                               # bf16 store


def _choose_tile_b(batch, requested):
    """Batch tile: multiple of 16, >= 2 grid steps when possible (v7x has 2
    TensorCores), and < ~12.5% dead-row padding on the last tile."""
    b16 = _round_up(max(batch, 1), 16)
    tb = max(16, min(_round_up(requested, 16), b16))
    if b16 > 16:  # make sure both v7x TCs get at least one grid step
        tb = min(tb, _round_up((b16 + 1) // 2, 16))
    while tb > 16:
        b_pad = _round_up(b16, tb)
        if (b_pad - b16) * 8 <= b_pad:  # padding waste <= 12.5%
            break
        tb -= 16
    return tb


def _build_call(N, H_pad, O_pad, tile_b, B_pad, x_itemsize, single_buffer_weights):
    def const_spec(shape):
        # Constant index map -> block DMA'd once, stays VMEM-resident across
        # the whole grid. Buffered(1) halves its VMEM footprint (v7x headroom).
        if single_buffer_weights:
            return pl.BlockSpec(shape, lambda i: (0, 0), pipeline_mode=pl.Buffered(1))
        return pl.BlockSpec(shape, lambda i: (0, 0))

    weight_bytes = (2 * (N * H_pad + H_pad * H_pad + H_pad * O_pad)   # bf16 weights
                    + 4 * (2 * H_pad + O_pad))                        # f32 biases
    flops = 2 * B_pad * (N * H_pad + H_pad * H_pad + H_pad * O_pad)
    bytes_accessed = B_pad * N * x_itemsize + weight_bytes + 2 * B_pad * O_pad

    # Per-step block buffers (x + out, double-buffered) plus resident weights.
    vmem_needed = (2 * tile_b * (N * x_itemsize + 2 * O_pad)
                   + (1 if single_buffer_weights else 2) * weight_bytes)
    compiler_kwargs = dict(dimension_semantics=("parallel",))
    if vmem_needed > 12 * 1024 * 1024:
        # Don't let v5e's 16 MiB scoped default gate tiling; cap at v7x's
        # 64 MiB physical VMEM.
        compiler_kwargs["vmem_limit_bytes"] = min(int(vmem_needed * 3 // 2),
                                                  64 * 1024 * 1024)

    return pl.pallas_call(
        _mlp_kernel,
        out_shape=jax.ShapeDtypeStruct((B_pad, O_pad), jnp.bfloat16),
        grid_spec=pltpu.PrefetchScalarGridSpec(
            num_scalar_prefetch=0,
            grid=(B_pad // tile_b,),
            in_specs=[
                pl.BlockSpec((tile_b, N), lambda i: (i, 0)),   # x tile (f32 in HBM)
                const_spec((N, H_pad)),                        # w1 (resident)
                const_spec((1, H_pad)),                        # b1
                const_spec((H_pad, H_pad)),                    # w2
                const_spec((1, H_pad)),                        # b2
                const_spec((H_pad, O_pad)),                    # w3
                const_spec((1, O_pad)),                        # b3
            ],
            out_specs=pl.BlockSpec((tile_b, O_pad), lambda i: (i, 0)),
        ),
        compiler_params=pltpu.CompilerParams(**compiler_kwargs),
        cost_estimate=pl.CostEstimate(flops=flops, transcendentals=0,
                                      bytes_accessed=bytes_accessed),
    )


def neural_eigenmap_forward(x, params, *, tile_b=512):
    """x: [B, num_nodes]. params: pre-transposed weights [in,out] + [1,out] biases."""
    w1, b1 = params["w1"], params["b1"]   # [N, H], [1, H]
    w2, b2 = params["w2"], params["b2"]   # [H, H], [1, H]
    w3, b3 = params["w3"], params["b3"]   # [H, O], [1, O]
    B, N = x.shape
    H = w1.shape[1]
    O = w3.shape[1]

    # Lane-pad hidden/output dims to multiples of 128 (zero padding is exact:
    # zero weight rows/cols and zero biases contribute nothing to the real
    # outputs, which are sliced back below). N stays unpadded (see header).
    H_pad = _round_up(H, 128)
    O_pad = _round_up(O, 128)

    tile_b = _choose_tile_b(B, tile_b)
    B_pad = _round_up(B, tile_b)

    # x keeps its original dtype; the bf16 cast happens in-kernel so the only
    # batch-scaled input touches HBM exactly once. Pad only if actually needed.
    xp = x if B_pad == B else jnp.pad(x, ((0, B_pad - B), (0, 0)))

    w1p = jnp.pad(w1, ((0, 0), (0, H_pad - H))).astype(jnp.bfloat16)
    b1p = jnp.pad(b1, ((0, 0), (0, H_pad - H))).astype(jnp.float32)
    w2p = jnp.pad(w2, ((0, H_pad - H), (0, H_pad - H))).astype(jnp.bfloat16)
    b2p = jnp.pad(b2, ((0, 0), (0, H_pad - H))).astype(jnp.float32)
    w3p = jnp.pad(w3, ((0, H_pad - H), (0, O_pad - O))).astype(jnp.bfloat16)
    b3p = jnp.pad(b3, ((0, 0), (0, O_pad - O))).astype(jnp.float32)

    args = (xp, w1p, b1p, w2p, b2p, w3p, b3p)
    x_itemsize = jnp.dtype(x.dtype).itemsize
    try:
        out_padded = _build_call(N, H_pad, O_pad, tile_b, B_pad, x_itemsize,
                                 single_buffer_weights=True)(*args)
    except Exception:
        # Fallback for JAX versions without BlockSpec(pipeline_mode=Buffered(1)).
        out_padded = _build_call(N, H_pad, O_pad, tile_b, B_pad, x_itemsize,
                                 single_buffer_weights=False)(*args)

    # Strip batch/output padding and cast back to the caller dtype (single
    # fused slice+cast under jit).
    return out_padded[:B, :O].astype(x.dtype)


def init_params(key, num_nodes, hidden_dim, num_outputs):
    """Deterministic init mimicking nn.Linear (uniform +-1/sqrt(fan_in)).

    Weights are stored already transposed to [in_features, out_features];
    biases as [1, out_features] for clean in-kernel broadcasting.
    """
    def linear(k, fan_in, fan_out):
        kw, kb = jax.random.split(k)
        bound = 1.0 / jnp.sqrt(jnp.float32(fan_in))
        w = jax.random.uniform(kw, (fan_in, fan_out), jnp.float32, -bound, bound)
        b = jax.random.uniform(kb, (1, fan_out), jnp.float32, -bound, bound)
        return w, b

    k1, k2, k3 = jax.random.split(key, 3)
    w1, b1 = linear(k1, num_nodes, hidden_dim)
    w2, b2 = linear(k2, hidden_dim, hidden_dim)
    w3, b3 = linear(k3, hidden_dim, num_outputs)
    return {"w1": w1, "b1": b1, "w2": w2, "b2": b2, "w3": w3, "b3": b3}


def _reference(x, p):
    # Pure-JAX f32 reference of the PyTorch forward.
    h1 = jnp.maximum(x @ p["w1"] + p["b1"], 0.0)
    h2 = jnp.maximum(h1 @ p["w2"] + p["b2"], 0.0)
    return h2 @ p["w3"] + p["b3"]


if __name__ == "__main__":
    num_nodes = 16
    hidden_dim = 64     # module default
    num_outputs = 10
    batch = 64

    key = jax.random.PRNGKey(0)
    kx, kp = jax.random.split(key)
    x = jax.random.normal(kx, (batch, num_nodes), jnp.float32)
    params = init_params(kp, num_nodes, hidden_dim, num_outputs)

    out = neural_eigenmap_forward(x, params)
    out = jax.block_until_ready(out)

    ref = _reference(x, params)
    assert out.shape == (batch, num_outputs)
    # Tolerance accounts for bf16 operands/activations/output (f32 accumulation).
    assert jnp.allclose(out, ref, atol=5e-2, rtol=5e-2), "mismatch vs reference"

    print("KERNEL_OK")
</pallas_src>

<mosaic_0001>
module attributes {stable_mosaic.version = 11 : i64} {
  func.func @_mlp_kernel(%arg0: i32, %arg1: memref<32x16xf32, #tpu.memory_space<vmem>>, %arg2: memref<16x128xbf16, #tpu.memory_space<vmem>>, %arg3: memref<1x128xf32, #tpu.memory_space<vmem>>, %arg4: memref<128x128xbf16, #tpu.memory_space<vmem>>, %arg5: memref<1x128xf32, #tpu.memory_space<vmem>>, %arg6: memref<128x128xbf16, #tpu.memory_space<vmem>>, %arg7: memref<1x128xf32, #tpu.memory_space<vmem>>, %arg8: memref<32x128xbf16, #tpu.memory_space<vmem>>) attributes {dimension_semantics = [#tpu.dimension_semantics<parallel>], iteration_bounds = array<i64: 2>, scalar_prefetch = 0 : i64, scratch_operands = 0 : i64, tpu.core_type = #tpu.core_type<tc>, window_params = [{transform_indices = @transform_0, window_bounds = array<i64: 32, 16>}, {pipeline_mode = #tpu.pipeline_mode<synchronous>, transform_indices = @transform_1, window_bounds = array<i64: 16, 128>}, {pipeline_mode = #tpu.pipeline_mode<synchronous>, transform_indices = @transform_2, window_bounds = array<i64: 1, 128>}, {pipeline_mode = #tpu.pipeline_mode<synchronous>, transform_indices = @transform_3, window_bounds = array<i64: 128, 128>}, {pipeline_mode = #tpu.pipeline_mode<synchronous>, transform_indices = @transform_4, window_bounds = array<i64: 1, 128>}, {pipeline_mode = #tpu.pipeline_mode<synchronous>, transform_indices = @transform_5, window_bounds = array<i64: 128, 128>}, {pipeline_mode = #tpu.pipeline_mode<synchronous>, transform_indices = @transform_6, window_bounds = array<i64: 1, 128>}, {transform_indices = @transform_7, window_bounds = array<i64: 32, 128>}]} {
    %c0 = arith.constant 0 : index
    %c0_0 = arith.constant 0 : index
    %0 = vector.load %arg1[%c0, %c0_0] : memref<32x16xf32, #tpu.memory_space<vmem>>, vector<32x16xf32>
    %1 = arith.truncf %0 : vector<32x16xf32> to vector<32x16xbf16>
    %c0_1 = arith.constant 0 : index
    %c0_2 = arith.constant 0 : index
    %2 = vector.load %arg2[%c0_1, %c0_2] : memref<16x128xbf16, #tpu.memory_space<vmem>>, vector<16x128xbf16>
    %cst = arith.constant dense<0.000000e+00> : vector<32x128xf32>
    %3 = tpu.matmul %1, %2, %cst {dimension_numbers = #tpu.dot_dimension_numbers<[1], [0], [0], [1], [0, 0, 1, 1], [], []>} : vector<32x16xbf16>, vector<16x128xbf16>, vector<32x128xf32> -> vector<32x128xf32>
    %c0_3 = arith.constant 0 : index
    %c0_4 = arith.constant 0 : index
    %4 = vector.load %arg3[%c0_3, %c0_4] : memref<1x128xf32, #tpu.memory_space<vmem>>, vector<1x128xf32>
    %5 = vector.broadcast %4 : vector<1x128xf32> to vector<32x128xf32>
    %6 = arith.addf %3, %5 : vector<32x128xf32>
    %cst_5 = arith.constant 0.000000e+00 : f32
    %7 = vector.broadcast %cst_5 : f32 to vector<32x128xf32>
    %8 = arith.maximumf %6, %7 : vector<32x128xf32>
    %9 = arith.truncf %8 : vector<32x128xf32> to vector<32x128xbf16>
    %c0_6 = arith.constant 0 : index
    %c0_7 = arith.constant 0 : index
    %10 = vector.load %arg4[%c0_6, %c0_7] : memref<128x128xbf16, #tpu.memory_space<vmem>>, vector<128x128xbf16>
    %cst_8 = arith.constant dense<0.000000e+00> : vector<32x128xf32>
    %11 = tpu.matmul %9, %10, %cst_8 {dimension_numbers = #tpu.dot_dimension_numbers<[1], [0], [0], [1], [0, 0, 1, 1], [], []>} : vector<32x128xbf16>, vector<128x128xbf16>, vector<32x128xf32> -> vector<32x128xf32>
    %c0_9 = arith.constant 0 : index
    %c0_10 = arith.constant 0 : index
    %12 = vector.load %arg5[%c0_9, %c0_10] : memref<1x128xf32, #tpu.memory_space<vmem>>, vector<1x128xf32>
    %13 = vector.broadcast %12 : vector<1x128xf32> to vector<32x128xf32>
    %14 = arith.addf %11, %13 : vector<32x128xf32>
    %cst_11 = arith.constant 0.000000e+00 : f32
    %15 = vector.broadcast %cst_11 : f32 to vector<32x128xf32>
    %16 = arith.maximumf %14, %15 : vector<32x128xf32>
    %17 = arith.truncf %16 : vector<32x128xf32> to vector<32x128xbf16>
    %c0_12 = arith.constant 0 : index
    %c0_13 = arith.constant 0 : index
    %18 = vector.load %arg6[%c0_12, %c0_13] : memref<128x128xbf16, #tpu.memory_space<vmem>>, vector<128x128xbf16>
    %cst_14 = arith.constant dense<0.000000e+00> : vector<32x128xf32>
    %19 = tpu.matmul %17, %18, %cst_14 {dimension_numbers = #tpu.dot_dimension_numbers<[1], [0], [0], [1], [0, 0, 1, 1], [], []>} : vector<32x128xbf16>, vector<128x128xbf16>, vector<32x128xf32> -> vector<32x128xf32>
    %c0_15 = arith.constant 0 : index
    %c0_16 = arith.constant 0 : index
    %20 = vector.load %arg7[%c0_15, %c0_16] : memref<1x128xf32, #tpu.memory_space<vmem>>, vector<1x128xf32>
    %21 = vector.broadcast %20 : vector<1x128xf32> to vector<32x128xf32>
    %22 = arith.addf %19, %21 : vector<32x128xf32>
    %23 = arith.truncf %22 : vector<32x128xf32> to vector<32x128xbf16>
    %c0_17 = arith.constant 0 : index
    %c0_18 = arith.constant 0 : index
    %24 = vector.load %arg8[%c0_17, %c0_18] : memref<32x128xbf16, #tpu.memory_space<vmem>>, vector<32x128xbf16>
    tpu.vector_store %arg8[%c0_17, %c0_18], %23 {strides = array<i32>} : memref<32x128xbf16, #tpu.memory_space<vmem>>, vector<32x128xbf16>,
    return
  }
  func.func @transform_0(%arg0: i32) -> (i32, i32) {
    %c0_i32 = arith.constant 0 : i32
    %c0_i32_0 = arith.constant 0 : i32
    return %arg0, %c0_i32 : i32, i32
  }
  func.func @transform_1(%arg0: i32) -> (i32, i32) {
    %c0_i32 = arith.constant 0 : i32
    %c0_i32_0 = arith.constant 0 : i32
    %c0_i32_1 = arith.constant 0 : i32
    return %c0_i32, %c0_i32_0 : i32, i32
  }
  func.func @transform_2(%arg0: i32) -> (i32, i32) {
    %c0_i32 = arith.constant 0 : i32
    %c0_i32_0 = arith.constant 0 : i32
    %c0_i32_1 = arith.constant 0 : i32
    return %c0_i32, %c0_i32_0 : i32, i32
  }
  func.func @transform_3(%arg0: i32) -> (i32, i32) {
    %c0_i32 = arith.constant 0 : i32
    %c0_i32_0 = arith.constant 0 : i32
    %c0_i32_1 = arith.constant 0 : i32
    return %c0_i32, %c0_i32_0 : i32, i32
  }
  func.func @transform_4(%arg0: i32) -> (i32, i32) {
    %c0_i32 = arith.constant 0 : i32
    %c0_i32_0 = arith.constant 0 : i32
    %c0_i32_1 = arith.constant 0 : i32
    return %c0_i32, %c0_i32_0 : i32, i32
  }
  func.func @transform_5(%arg0: i32) -> (i32, i32) {
    %c0_i32 = arith.constant 0 : i32
    %c0_i32_0 = arith.constant 0 : i32
    %c0_i32_1 = arith.constant 0 : i32
    return %c0_i32, %c0_i32_0 : i32, i32
  }
  func.func @transform_6(%arg0: i32) -> (i32, i32) {
    %c0_i32 = arith.constant 0 : i32
    %c0_i32_0 = arith.constant 0 : i32
    %c0_i32_1 = arith.constant 0 : i32
    return %c0_i32, %c0_i32_0 : i32, i32
  }
  func.func @transform_7(%arg0: i32) -> (i32, i32) {
    %c0_i32 = arith.constant 0 : i32
    %c0_i32_0 = arith.constant 0 : i32
    return %arg0, %c0_i32 : i32, i32
  }
}

module attributes {stable_mosaic.version = 11 : i64} {
  func.func @_mlp_kernel(%arg0: i32, %arg1: memref<32x16xf32, #tpu.memory_space<vmem>>, %arg2: memref<16x128xbf16, #tpu.memory_space<vmem>>, %arg3: memref<1x128xf32, #tpu.memory_space<vmem>>, %arg4: memref<128x128xbf16, #tpu.memory_space<vmem>>, %arg5: memref<1x128xf32, #tpu.memory_space<vmem>>, %arg6: memref<128x128xbf16, #tpu.memory_space<vmem>>, %arg7: memref<1x128xf32, #tpu.memory_space<vmem>>, %arg8: memref<32x128xbf16, #tpu.memory_space<vmem>>) attributes {dimension_semantics = [#tpu.dimension_semantics<parallel>], iteration_bounds = array<i64: 2>, scalar_prefetch = 0 : i64, scratch_operands = 0 : i64, tpu.core_type = #tpu.core_type<tc>, window_params = [{transform_indices = @transform_0, window_bounds = array<i64: 32, 16>}, {pipeline_mode = #tpu.pipeline_mode<synchronous>, transform_indices = @transform_1, window_bounds = array<i64: 16, 128>}, {pipeline_mode = #tpu.pipeline_mode<synchronous>, transform_indices = @transform_2, window_bounds = array<i64: 1, 128>}, {pipeline_mode = #tpu.pipeline_mode<synchronous>, transform_indices = @transform_3, window_bounds = array<i64: 128, 128>}, {pipeline_mode = #tpu.pipeline_mode<synchronous>, transform_indices = @transform_4, window_bounds = array<i64: 1, 128>}, {pipeline_mode = #tpu.pipeline_mode<synchronous>, transform_indices = @transform_5, window_bounds = array<i64: 128, 128>}, {pipeline_mode = #tpu.pipeline_mode<synchronous>, transform_indices = @transform_6, window_bounds = array<i64: 1, 128>}, {transform_indices = @transform_7, window_bounds = array<i64: 32, 128>}]} {
    %c0 = arith.constant 0 : index
    %c0_0 = arith.constant 0 : index
    %0 = vector.load %arg1[%c0, %c0_0] : memref<32x16xf32, #tpu.memory_space<vmem>>, vector<32x16xf32>
    %1 = arith.truncf %0 : vector<32x16xf32> to vector<32x16xbf16>
    %c0_1 = arith.constant 0 : index
    %c0_2 = arith.constant 0 : index
    %2 = vector.load %arg2[%c0_1, %c0_2] : memref<16x128xbf16, #tpu.memory_space<vmem>>, vector<16x128xbf16>
    %cst = arith.constant dense<0.000000e+00> : vector<32x128xf32>
    %3 = tpu.matmul %1, %2, %cst {dimension_numbers = #tpu.dot_dimension_numbers<[1], [0], [0], [1], [0, 0, 1, 1], [], []>} : vector<32x16xbf16>, vector<16x128xbf16>, vector<32x128xf32> -> vector<32x128xf32>
    %c0_3 = arith.constant 0 : index
    %c0_4 = arith.constant 0 : index
    %4 = vector.load %arg3[%c0_3, %c0_4] : memref<1x128xf32, #tpu.memory_space<vmem>>, vector<1x128xf32>
    %5 = vector.broadcast %4 : vector<1x128xf32> to vector<32x128xf32>
    %6 = arith.addf %3, %5 : vector<32x128xf32>
    %cst_5 = arith.constant 0.000000e+00 : f32
    %7 = vector.broadcast %cst_5 : f32 to vector<32x128xf32>
    %8 = arith.maximumf %6, %7 : vector<32x128xf32>
    %9 = arith.truncf %8 : vector<32x128xf32> to vector<32x128xbf16>
    %c0_6 = arith.constant 0 : index
    %c0_7 = arith.constant 0 : index
    %10 = vector.load %arg4[%c0_6, %c0_7] : memref<128x128xbf16, #tpu.memory_space<vmem>>, vector<128x128xbf16>
    %cst_8 = arith.constant dense<0.000000e+00> : vector<32x128xf32>
    %11 = tpu.matmul %9, %10, %cst_8 {dimension_numbers = #tpu.dot_dimension_numbers<[1], [0], [0], [1], [0, 0, 1, 1], [], []>} : vector<32x128xbf16>, vector<128x128xbf16>, vector<32x128xf32> -> vector<32x128xf32>
    %c0_9 = arith.constant 0 : index
    %c0_10 = arith.constant 0 : index
    %12 = vector.load %arg5[%c0_9, %c0_10] : memref<1x128xf32, #tpu.memory_space<vmem>>, vector<1x128xf32>
    %13 = vector.broadcast %12 : vector<1x128xf32> to vector<32x128xf32>
    %14 = arith.addf %11, %13 : vector<32x128xf32>
    %cst_11 = arith.constant 0.000000e+00 : f32
    %15 = vector.broadcast %cst_11 : f32 to vector<32x128xf32>
    %16 = arith.maximumf %14, %15 : vector<32x128xf32>
    %17 = arith.truncf %16 : vector<32x128xf32> to vector<32x128xbf16>
    %c0_12 = arith.constant 0 : index
    %c0_13 = arith.constant 0 : index
    %18 = vector.load %arg6[%c0_12, %c0_13] : memref<128x128xbf16, #tpu.memory_space<vmem>>, vector<128x128xbf16>
    %cst_14 = arith.constant dense<0.000000e+00> : vector<32x128xf32>
    %19 = tpu.matmul %17, %18, %cst_14 {dimension_numbers = #tpu.dot_dimension_numbers<[1], [0], [0], [1], [0, 0, 1, 1], [], []>} : vector<32x128xbf16>, vector<128x128xbf16>, vector<32x128xf32> -> vector<32x128xf32>
    %c0_15 = arith.constant 0 : index
    %c0_16 = arith.constant 0 : index
    %20 = vector.load %arg7[%c0_15, %c0_16] : memref<1x128xf32, #tpu.memory_space<vmem>>, vector<1x128xf32>
    %21 = vector.broadcast %20 : vector<1x128xf32> to vector<32x128xf32>
    %22 = arith.addf %19, %21 : vector<32x128xf32>
    %23 = arith.truncf %22 : vector<32x128xf32> to vector<32x128xbf16>
    %c0_17 = arith.constant 0 : index
    %c0_18 = arith.constant 0 : index
    %24 = vector.load %arg8[%c0_17, %c0_18] : memref<32x128xbf16, #tpu.memory_space<vmem>>, vector<32x128xbf16>
    tpu.vector_store %arg8[%c0_17, %c0_18], %23 {strides = array<i32>} : memref<32x128xbf16, #tpu.memory_space<vmem>>, vector<32x128xbf16>,
    return
  }
  func.func @transform_0(%arg0: i32) -> (i32, i32) {
    %c0_i32 = arith.constant 0 : i32
    %c0_i32_0 = arith.constant 0 : i32
    return %arg0, %c0_i32 : i32, i32
  }
  func.func @transform_1(%arg0: i32) -> (i32, i32) {
    %c0_i32 = arith.constant 0 : i32
    %c0_i32_0 = arith.constant 0 : i32
    %c0_i32_1 = arith.constant 0 : i32
    return %c0_i32, %c0_i32_0 : i32, i32
  }
  func.func @transform_2(%arg0: i32) -> (i32, i32) {
    %c0_i32 = arith.constant 0 : i32
    %c0_i32_0 = arith.constant 0 : i32
    %c0_i32_1 = arith.constant 0 : i32
    return %c0_i32, %c0_i32_0 : i32, i32
  }
  func.func @transform_3(%arg0: i32) -> (i32, i32) {
    %c0_i32 = arith.constant 0 : i32
    %c0_i32_0 = arith.constant 0 : i32
    %c0_i32_1 = arith.constant 0 : i32
    return %c0_i32, %c0_i32_0 : i32, i32
  }
  func.func @transform_4(%arg0: i32) -> (i32, i32) {
    %c0_i32 = arith.constant 0 : i32
    %c0_i32_0 = arith.constant 0 : i32
    %c0_i32_1 = arith.constant 0 : i32
    return %c0_i32, %c0_i32_0 : i32, i32
  }
  func.func @transform_5(%arg0: i32) -> (i32, i32) {
    %c0_i32 = arith.constant 0 : i32
    %c0_i32_0 = arith.constant 0 : i32
    %c0_i32_1 = arith.constant 0 : i32
    return %c0_i32, %c0_i32_0 : i32, i32
  }
  func.func @transform_6(%arg0: i32) -> (i32, i32) {
    %c0_i32 = arith.constant 0 : i32
    %c0_i32_0 = arith.constant 0 : i32
    %c0_i32_1 = arith.constant 0 : i32
    return %c0_i32, %c0_i32_0 : i32, i32
  }
  func.func @transform_7(%arg0: i32) -> (i32, i32) {
    %c0_i32 = arith.constant 0 : i32
    %c0_i32_0 = arith.constant 0 : i32
    return %arg0, %c0_i32 : i32, i32
  }
}

</mosaic_0001>

<bundles_post_ra>
// kernel: tpu_custom_call.1
= control target key start
LH: loop header
LB: loop body
LE: loop exit
PB: predicated region body
PF: predicated region fallthrough
CT: control target
= control target key end

     0   :  { %12 = vsyncpa [#allocation3], 0  ;;  %s1087_s0 = inlined_call_operand.vmem [shape: f32[64,16], index: 0, kind: input, shape index: {}]   ;;  %s1088_s1 = inlined_call_operand.vmem [shape: bf16[16,128], index: 1, kind: input, shape index: {}]   ;;  %s1089_s2 = inlined_call_operand.vmem [shape: f32[1,128], index: 2, kind: input, shape index: {}]   ;;  %s1090_s3 = inlined_call_operand.vmem [shape: bf16[128,128], index: 3, kind: input, shape index: {}]   ;;  %s1091_s4 = inlined_call_operand.vmem [shape: f32[1,128], index: 4, kind: input, shape index: {}]   ;;  %s1092_s5 = inlined_call_operand.hbm [shape: bf16[128,128], index: 5, kind: input, shape index: {}]   ;;  %s1093_s6 = inlined_call_operand.vmem [shape: f32[1,128], index: 6, kind: input, shape index: {}]   ;;  %s1094_s7 = inlined_call_operand.hbm [shape: bf16[64,128], index: 7, kind: output, shape index: {}]  }
   0x1   :  { %13 = vsyncpa [#allocation4], 0 }
   0x2   :  { %15 = vsyncpa [#allocation4 + $0x1], 0  ;;  %s955_s24 = smov 0   ;;  %s957_s25 = smov 0  }
   0x3   :  { %s959_s26 = smov 0   ;;  %s961_s27 = smov 0  }
   0x4 LB: > { %s976_s28 = sadd.s32 4294967295, %s908_s27   ;;  %s626_s29 = sadd.s32 4294967294, %s908_s27   ;;  %s908_s27 = sphi %s961_s27, %s1100_s27   ;;  %s904_s26 = sphi %s959_s26, %s1099_s26   ;;  %s900_s25 = sphi %s957_s25, %s1098_s25   ;;  %s896_s24 = sphi %s955_s24, %s1097_s24  }
   0x5   : > { %s980_s30 = sadd.s32 1, %s908_s27   ;;  %s180_s8 = sadd.s32 1, %s904_s26 }
   0x6   : > { %s177_s9 = ssub.s32 %s908_s27, %s980_s30  ;;  %p190_p0 = scmp.ne.s32.totalorder %s904_s26, %s900_s25 }
   0x7   : > { %p178_p1 = scmp.eq.s32.totalorder %s177_s9, 0  ;;  %p191_p2 = scmp.eq.s32.totalorder %s976_s28, 1 }
   0x8   : > { %p196_p3 = scmp.ne.s32.totalorder %s900_s25, %s896_s24  ;;  %p197_p4 = scmp.eq.s32.totalorder %s626_s29, 1 }
   0x9   : > { %s991_s10 = scalar_select %p178_p1, %s904_s26, %s180_s8  }
   0xa   : > { %p993_p5 = por %p191_p2, %p190_p0  ;;  %p997_p6 = por %p197_p4, %p196_p3 }
   0xb   : > { %p627_p7 = scmp.ge.s32.totalorder %s908_s27, 1  ;;  %p204_p8 = scmp.lt.s32.totalorder %s908_s27, 3 }
   0xc   : > { %p769_p9 = scmp.eq.s32.totalorder %s976_s28, 0  ;;  %s227_s15 = sshll.u32 %s1092_s5, 4  ;;  %s228_s15 = int_to_ptr.hbm [resolvable:$true] %s227_s15 }
   0xd   : > { %p205_p10 = pnand %p627_p7, %p204_p8  ;;  %s910_s16 = smov [#allocation2]  }
   0xe   : > { %s229_s17 = sshll.u32 %s910_s16, 4  ;;  %s911_s18 = smov 64   ;;  %s230_s17 = int_to_ptr.vmem [resolvable:$true] %s229_s17 }
   0xf   : > { %p761_p11 = pneg %p205_p10  ;;  %s912_s19 = smov 4  }
  0x10   : > { %257 = sbr.rel (%p205_p10) target bundleno = 481 (0x1e1), region = 48 }
  0x11   : > { %p762_p12 = pnand %p769_p9, %p761_p11 }
  0x13   : > { %764 = dma.hbm_to_vmem [thread:$0]  (!%p762_p12), %s228_s15, 1024, %s230_s17, [#allocation3], %s911_s18, %s911_s18, %s912_s19  }
  0x15   : > { %887 = dma.done.wait (%p769_p9), [#allocation3], 1024  }
  0x16   : > { %889 = vsyncadd (%p769_p9), [#allocation3], 4294966272  ;;  %s633_s20 = sshll.u32 %s976_s28, 2  ;;  %v710_v0 = vld [vmem:[%s1088_s1] sm:$0xff]  ;;  %v718_v4 = vld [vmem:[%s1090_s3 + $0x38] sm:$0xff]  ;;  %vm316_vm0 = vcmask 130048  }
  0x17   : > { %p291_p13 = scmp.lt.s32.totalorder %s633_s20, 7  ;;  %330 = vmatpush.bf16.msra.mxu0 %v710_v0  ;;  %416 = vmatpush.bf16.msra.mxu1 %v718_v4  ;;  %v717_v5 = vld [vmem:[%s1090_s3 + $0x30] sm:$0xff]  ;;  %v716_v6 = vld [vmem:[%s1090_s3 + $0x28] sm:$0xff]  ;;  %v715_v7 = vld [vmem:[%s1090_s3 + $0x20] sm:$0xff]  ;;  %s287_s19 = sand.u32 1, %s900_s25  }
  0x18   : > { %739 = vmatpush.bf16.msra.mxu3 %v718_v4  ;;  %v714_v11 = vld [vmem:[%s1090_s3 + $0x18] sm:$0xff]  ;;  %v713_v12 = vld [vmem:[%s1090_s3 + $0x10] sm:$0xff]  ;;  %v712_v13 = vld [vmem:[%s1090_s3 + $0x8] sm:$0xff]  ;;  %s632_s22 = sshll.u32 %s287_s19, 4  ;;  %s727_s8 = sshll.u32 %s976_s28, 4 }
  0x19   : > { %s1102_s20 = smov (!%p291_p13, %s633_s20), 7  ;;  %v711_v14 = vld [vmem:[%s1090_s3] sm:$0xff]  ;;  %v726_v15 = vld [vmem:[#allocation2 + $0x38] sm:$0xff]  ;;  %v725_v17 = vld [vmem:[#allocation2 + $0x30] sm:$0xff]  ;;  %s289_s23 = scalar_lea.vmem [#allocation5], %s632_s22 }
  0x1a   : > { %s634_s21 = sshll.u32 %s1102_s20, 3  ;;  %747 = vmatpush.bf16.msra.mxu2 %v726_v15  ;;  %v809_v18 = vld [vmem:[%s1089_s2] ss:$0 sm:$0xff]  ;;  %v724_v19 = vld [vmem:[#allocation2 + $0x28] sm:$0xff]  ;;  %v722_v34 = vld [vmem:[#allocation2 + $0x18] sm:$0xff]  ;;  %s549_s14 = sshll.u32 %s289_s23, 4  ;;  %s550_s14 = int_to_ptr.vmem [resolvable:$true] %s549_s14 }
  0x1b   : > { %s294_s29 = scalar_lea.vmem %s1087_s0, %s634_s21  ;;  %417 = vmatpush.bf16.msra.mxu1 %v717_v5  ;;  %509 = vmatpush.bf16.msrb.mxu0 %v726_v15  ;;  %v723_v23 = vld [vmem:[#allocation2 + $0x20] sm:$0xff]  ;;  %v721_v35 = vld [vmem:[#allocation2 + $0x10] sm:$0xff]  ;;  %v720_v36 = vld [vmem:[#allocation2 + $0x8] sm:$0xff]  ;;  %s537_s16 = scalar_lea.sflag [#allocation4], %s287_s19 }
  0x1c   : > { %v298_v1 = vld [vmem:[%s294_s29] sm:$0xff]  ;;  %v299_v2 = vld [vmem:[%s294_s29 + $0x8] sm:$0xff]  ;;  %740 = vmatpush.bf16.msra.mxu3 %v717_v5  ;;  %v300_v8 = vld [vmem:[%s294_s29 + $0x10] sm:$0xff]  ;;  %s862_s21 = scalar_lea.hbm %s1094_s7, 32 }
  0x1d   : > { %v302_v3 = vpack.c.bf16 %v299_v2, %v298_v1  ;;  %v301_v9 = vld [vmem:[%s294_s29 + $0x18] sm:$0xff]  ;;  %v719_v37 = vld [vmem:[#allocation2] sm:$0xff]  ;;  %s548_s29 = scalar_lea.hbm %s1094_s7, %s727_s8 }
  0x1e   : > { %v303_v10 = vpack.c.bf16 %v301_v9, %v300_v8  ;;  %748 = vmatpush.bf16.msra.mxu2 %v725_v17  ;;  %v810_v39 = vld [vmem:[%s1091_s4] ss:$0 sm:$0xff]  ;;  %s551_s15 = sshll.u32 %s548_s29, 4  ;;  %s552_s15 = int_to_ptr.hbm [resolvable:$true] %s551_s15 }
  0x1f   : > { %639 = vmatmul.msk.bf16.vlgmr.msra.gmra.mxu0 %vm316_vm0, %v302_v3  ;;  %418 = vmatpush.bf16.msra.mxu1 %v716_v6  ;;  %v811_v54 = vld [vmem:[%s1093_s6] ss:$0 sm:$0xff]  ;;  %s856_s17 = sshra.s32 %s552_s15, 4  ;;  %s857_s17 = int_to_ptr.hbm [resolvable:$true] %s856_s17 }
  0x20   : > { %741 = vmatpush.bf16.msra.mxu3 %v716_v6  ;;  %510 = vmatpush.bf16.msrb.mxu0 %v725_v17  ;;  %s858_s18 = scalar_lea.hbm %s857_s17, 16  ;;  %p863_p3 = scmp.lt.s32.totalorder %s857_s17, %s1094_s7 }
  0x21   : > { %p859_p0 = scmp.ne.s32.totalorder %s857_s17, %s858_s18  ;;  %p864_p4 = scmp.lt.s32.totalorder %s862_s21, %s858_s18 }
  0x22   : > { %749 = vmatpush.bf16.msra.mxu2 %v724_v19 }
  0x23   : > { %419 = vmatpush.bf16.msra.mxu1 %v715_v7  ;;  %p860_p1 = pnand %p859_p0, %p993_p5  ;;  %p865_p7 = por %p864_p4, %p863_p3 }
  0x24   : > { %742 = vmatpush.bf16.msra.mxu3 %v715_v7  ;;  %511 = vmatpush.bf16.msrb.mxu0 %v724_v19 }
  0x25   : > { %p861_p2 = pneg %p860_p1 }
  0x26   : > { %750 = vmatpush.bf16.msra.mxu2 %v723_v23 }
  0x27   : > { %420 = vmatpush.bf16.msra.mxu1 %v714_v11  ;;  %p866_p8 = pnand %p865_p7, %p861_p2 }
  0x28   : > { %743 = vmatpush.bf16.msra.mxu3 %v714_v11  ;;  %512 = vmatpush.bf16.msrb.mxu0 %v723_v23 }
  0x2a   : > { %751 = vmatpush.bf16.msra.mxu2 %v722_v34 }
  0x2b   : > { %421 = vmatpush.bf16.msra.mxu1 %v713_v12 }
  0x2c   : > { %744 = vmatpush.bf16.msra.mxu3 %v713_v12  ;;  %513 = vmatpush.bf16.msrb.mxu0 %v722_v34 }
  0x2e   : > { %752 = vmatpush.bf16.msra.mxu2 %v721_v35 }
  0x2f   : > { %640 = vmatmul.msk.bf16.gmra.mxu0 %vm316_vm0, %v303_v10  ;;  %422 = vmatpush.bf16.msra.mxu1 %v712_v13 }
  0x30   : > { %745 = vmatpush.bf16.msra.mxu3 %v712_v13  ;;  %514 = vmatpush.bf16.msrb.mxu0 %v721_v35 }
  0x32   : > { %753 = vmatpush.bf16.msra.mxu2 %v720_v36 }
  0x33   : > { %423 = vmatpush.bf16.msra.mxu1 %v711_v14 }
  0x34   : > { %746 = vmatpush.bf16.msra.mxu3 %v711_v14  ;;  %515 = vmatpush.bf16.msrb.mxu0 %v720_v36 }
  0x36   : > { %754 = vmatpush.bf16.msra.mxu2 %v719_v37 }
  0x38   : > { %516 = vmatpush.bf16.msrb.mxu0 %v719_v37 }
  0x9c   : > { %v332_v16 = vpop.f32.mrf.mxu0 }
  0x9d   : > { %v333_v20 = vadd.f32 %v809_v18, %v332_v16 }
  0x9f   : > { %v342_v24 = vmax.f32 %v333_v20, 0.0 }
  0xa4   : > { %v334_v21 = vpop.f32.mrf.mxu0 }
  0xa5   : > { %v335_v22 = vadd.f32 %v809_v18, %v334_v21 }
  0xa7   : > { %v343_v25 = vmax.f32 %v335_v22, 0.0 }
  0xa9   : > { %v346_v26 = vpack.c.bf16 %v343_v25, %v342_v24 }
  0xab   : > { %424 = vmatmul.bf16.vlgmr.msra.gmra.mxu1 %v346_v26 }
  0xac   : > { %v337_v27 = vpop.f32.mrf.mxu0 }
  0xad   : > { %v338_v28 = vadd.f32 %v809_v18, %v337_v27 }
  0xaf   : > { %v344_v31 = vmax.f32 %v338_v28, 0.0 }
  0xb4   : > { %v339_v29 = vpop.f32.mrf.mxu0 }
  0xb5   : > { %v340_v30 = vadd.f32 %v809_v18, %v339_v29 }
  0xb7   : > { %v345_v32 = vmax.f32 %v340_v30, 0.0 }
  0xb9   : > { %v347_v33 = vpack.c.bf16 %v345_v32, %v344_v31 }
  0xbb   : > { %429 = vmatmul.bf16.vlgmr.msra.gmra.mxu3 %v347_v33 }
 0x128   : > { %v425_v38 = vpop.f32.mrf.mxu1 }
 0x129   : > { %v426_v40 = vadd.f32 %v810_v39, %v425_v38 }
 0x12b   : > { %v435_v43 = vmax.f32 %v426_v40, 0.0 }
 0x130   : > { %v427_v41 = vpop.f32.mrf.mxu1 }
 0x131   : > { %v428_v42 = vadd.f32 %v810_v39, %v427_v41 }
 0x133   : > { %v436_v44 = vmax.f32 %v428_v42, 0.0 }
 0x135   : > { %v439_v45 = vpack.c.bf16 %v436_v44, %v435_v43 }
 0x137   : > { %517 = vmatmul.bf16.vlgmr.msrb.gmra.mxu0 %v439_v45 }
 0x13e   : > { %v430_v46 = vpop.f32.mrf.mxu3 }
 0x13f   : > { %v431_v47 = vadd.f32 %v810_v39, %v430_v46 }
 0x141   : > { %v437_v50 = vmax.f32 %v431_v47, 0.0 }
 0x146   : > { %v432_v48 = vpop.f32.mrf.mxu3 }
 0x147   : > { %v433_v49 = vadd.f32 %v810_v39, %v432_v48 }
 0x149   : > { %v438_v51 = vmax.f32 %v433_v49, 0.0 }
 0x14b   : > { %v440_v52 = vpack.c.bf16 %v438_v51, %v437_v50 }
 0x14d   : > { %522 = vmatmul.bf16.vlgmr.msra.gmra.mxu2 %v440_v52 }
 0x1b4   : > { %v518_v53 = vpop.f32.mrf.mxu0 }
 0x1b5   : > { %v519_v56 = vadd.f32 %v811_v54, %v518_v53 }
 0x1bc   : > { %v520_v55 = vpop.f32.mrf.mxu0 }
 0x1bd   : > { %v521_v57 = vadd.f32 %v811_v54, %v520_v55 }
 0x1bf   : > { %v731_v58 = vpack.c.bf16 %v521_v57, %v519_v56 }
 0x1c1   : > { %732 = vst [vmem:[%s289_s23] sm:$0xff] %v731_v58  }
 0x1d0   : > { %v523_v59 = vpop.f32.mrf.mxu2 }
 0x1d1   : > { %v524_v61 = vadd.f32 %v811_v54, %v523_v59 }
 0x1d8   : > { %v525_v60 = vpop.f32.mrf.mxu2 }
 0x1d9   : > { %v526_v62 = vadd.f32 %v811_v54, %v525_v60 }
 0x1db   : > { %v736_v63 = vpack.c.bf16 %v526_v62, %v524_v61 }
 0x1dd   : > { %738 = vst [vmem:[%s289_s23 + $0x8] sm:$0xff] %v736_v63  }
 0x1de   : > { %869 = shalt.err (!%p866_p8)
}
 0x1df   : > { %s913_s19 = smov 64   ;;  %s914_s23 = smov 4  }
 0x1e0   : > { %759 = dma.vmem_to_hbm [thread:$0]  (%p993_p5), %s550_s14, 256, %s552_s15, %s537_s16, %s913_s19, %s913_s19, %s914_s23  }
 0x1e1 PF: > { %p771_p9 = scmp.ge.s32.totalorder %s908_s27, 2  ;;  %s566_s9 = sand.u32 1, %s896_s24  }
 0x1e2   : > { %s567_s13 = scalar_lea.sflag [#allocation4], %s566_s9 }
 0x1e3   : > { %p766_p10 = pnand %p771_p9, %p997_p6 }
 0x1e5   : > { %p767_p11 = pneg %p766_p10 }
 0x1e7   : > { %891 = dma.done.wait (%p767_p11), %s567_s13, 256  }
 0x1e8   : > { %893 = vsyncadd (%p767_p11), %s567_s13, 4294967040  ;;  %p18_p12 = scmp.ge.s32.totalorder %s980_s30, 4   ;;  %s1097_s24 = smov %s900_s25 }
 0x1e9   : > { %s1098_s25 = smov %s904_s26  ;;  %s1099_s26 = smov %s991_s10 }
 0x1ea   : > { %s1100_s27 = smov %s980_s30  ;;  %20 = sbr.rel (!%p18_p12) target bundleno = 4 (0x4), region = 88 }
 0x1ef   :  { %573 = vsyncpa [#allocation3], 1 }
 0x1f0   :  { %575 = vsyncpa [#allocation3 + $0x1], 1 }
 0x1f1   :  { %576 = vsyncpa [#allocation4], 1 }
 0x1f2   :  { %578 = vsyncpa [#allocation4 + $0x1], 1 }

// kernel: tpu_custom_call.1
= control target key start
LH: loop header
LB: loop body
LE: loop exit
PB: predicated region body
PF: predicated region fallthrough
CT: control target
= control target key end

     0   :  { %12 = vsyncpa [#allocation3], 0  ;;  %s1087_s0 = inlined_call_operand.vmem [shape: f32[64,16], index: 0, kind: input, shape index: {}]   ;;  %s1088_s1 = inlined_call_operand.vmem [shape: bf16[16,128], index: 1, kind: input, shape index: {}]   ;;  %s1089_s2 = inlined_call_operand.vmem [shape: f32[1,128], index: 2, kind: input, shape index: {}]   ;;  %s1090_s3 = inlined_call_operand.vmem [shape: bf16[128,128], index: 3, kind: input, shape index: {}]   ;;  %s1091_s4 = inlined_call_operand.vmem [shape: f32[1,128], index: 4, kind: input, shape index: {}]   ;;  %s1092_s5 = inlined_call_operand.hbm [shape: bf16[128,128], index: 5, kind: input, shape index: {}]   ;;  %s1093_s6 = inlined_call_operand.vmem [shape: f32[1,128], index: 6, kind: input, shape index: {}]   ;;  %s1094_s7 = inlined_call_operand.hbm [shape: bf16[64,128], index: 7, kind: output, shape index: {}]  }
   0x1   :  { %13 = vsyncpa [#allocation4], 0 }
   0x2   :  { %15 = vsyncpa [#allocation4 + $0x1], 0  ;;  %s955_s24 = smov 0   ;;  %s957_s25 = smov 0  }
   0x3   :  { %s959_s26 = smov 0   ;;  %s961_s27 = smov 0  }
   0x4 LB: > { %s976_s28 = sadd.s32 4294967295, %s908_s27   ;;  %s626_s29 = sadd.s32 4294967294, %s908_s27   ;;  %s908_s27 = sphi %s961_s27, %s1100_s27   ;;  %s904_s26 = sphi %s959_s26, %s1099_s26   ;;  %s900_s25 = sphi %s957_s25, %s1098_s25   ;;  %s896_s24 = sphi %s955_s24, %s1097_s24  }
   0x5   : > { %s980_s30 = sadd.s32 1, %s908_s27   ;;  %s180_s8 = sadd.s32 1, %s904_s26 }
   0x6   : > { %s177_s9 = ssub.s32 %s908_s27, %s980_s30  ;;  %p190_p0 = scmp.ne.s32.totalorder %s904_s26, %s900_s25 }
   0x7   : > { %p178_p1 = scmp.eq.s32.totalorder %s177_s9, 0  ;;  %p191_p2 = scmp.eq.s32.totalorder %s976_s28, 1 }
   0x8   : > { %p196_p3 = scmp.ne.s32.totalorder %s900_s25, %s896_s24  ;;  %p197_p4 = scmp.eq.s32.totalorder %s626_s29, 1 }
   0x9   : > { %s991_s10 = scalar_select %p178_p1, %s904_s26, %s180_s8  }
   0xa   : > { %p993_p5 = por %p191_p2, %p190_p0  ;;  %p997_p6 = por %p197_p4, %p196_p3 }
   0xb   : > { %p627_p7 = scmp.ge.s32.totalorder %s908_s27, 1  ;;  %p204_p8 = scmp.lt.s32.totalorder %s908_s27, 3 }
   0xc   : > { %p769_p9 = scmp.eq.s32.totalorder %s976_s28, 0  ;;  %s227_s15 = sshll.u32 %s1092_s5, 4  ;;  %s228_s15 = int_to_ptr.hbm [resolvable:$true] %s227_s15 }
   0xd   : > { %p205_p10 = pnand %p627_p7, %p204_p8  ;;  %s910_s16 = smov [#allocation2]  }
   0xe   : > { %s229_s17 = sshll.u32 %s910_s16, 4  ;;  %s911_s18 = smov 64   ;;  %s230_s17 = int_to_ptr.vmem [resolvable:$true] %s229_s17 }
   0xf   : > { %p761_p11 = pneg %p205_p10  ;;  %s912_s19 = smov 4  }
  0x10   : > { %257 = sbr.rel (%p205_p10) target bundleno = 481 (0x1e1), region = 48 }
  0x11   : > { %p762_p12 = pnand %p769_p9, %p761_p11 }
  0x13   : > { %764 = dma.hbm_to_vmem [thread:$0]  (!%p762_p12), %s228_s15, 1024, %s230_s17, [#allocation3], %s911_s18, %s911_s18, %s912_s19  }
  0x15   : > { %887 = dma.done.wait (%p769_p9), [#allocation3], 1024  }
  0x16   : > { %889 = vsyncadd (%p769_p9), [#allocation3], 4294966272  ;;  %s633_s20 = sshll.u32 %s976_s28, 2  ;;  %v710_v0 = vld [vmem:[%s1088_s1] sm:$0xff]  ;;  %v718_v4 = vld [vmem:[%s1090_s3 + $0x38] sm:$0xff]  ;;  %vm316_vm0 = vcmask 130048  }
  0x17   : > { %p291_p13 = scmp.lt.s32.totalorder %s633_s20, 7  ;;  %330 = vmatpush.bf16.msra.mxu0 %v710_v0  ;;  %416 = vmatpush.bf16.msra.mxu1 %v718_v4  ;;  %v717_v5 = vld [vmem:[%s1090_s3 + $0x30] sm:$0xff]  ;;  %v716_v6 = vld [vmem:[%s1090_s3 + $0x28] sm:$0xff]  ;;  %v715_v7 = vld [vmem:[%s1090_s3 + $0x20] sm:$0xff]  ;;  %s287_s19 = sand.u32 1, %s900_s25  }
  0x18   : > { %739 = vmatpush.bf16.msra.mxu3 %v718_v4  ;;  %v714_v11 = vld [vmem:[%s1090_s3 + $0x18] sm:$0xff]  ;;  %v713_v12 = vld [vmem:[%s1090_s3 + $0x10] sm:$0xff]  ;;  %v712_v13 = vld [vmem:[%s1090_s3 + $0x8] sm:$0xff]  ;;  %s632_s22 = sshll.u32 %s287_s19, 4  ;;  %s727_s8 = sshll.u32 %s976_s28, 4 }
  0x19   : > { %s1102_s20 = smov (!%p291_p13, %s633_s20), 7  ;;  %v711_v14 = vld [vmem:[%s1090_s3] sm:$0xff]  ;;  %v726_v15 = vld [vmem:[#allocation2 + $0x38] sm:$0xff]  ;;  %v725_v17 = vld [vmem:[#allocation2 + $0x30] sm:$0xff]  ;;  %s289_s23 = scalar_lea.vmem [#allocation5], %s632_s22 }
  0x1a   : > { %s634_s21 = sshll.u32 %s1102_s20, 3  ;;  %747 = vmatpush.bf16.msra.mxu2 %v726_v15  ;;  %v809_v18 = vld [vmem:[%s1089_s2] ss:$0 sm:$0xff]  ;;  %v724_v19 = vld [vmem:[#allocation2 + $0x28] sm:$0xff]  ;;  %v722_v34 = vld [vmem:[#allocation2 + $0x18] sm:$0xff]  ;;  %s549_s14 = sshll.u32 %s289_s23, 4  ;;  %s550_s14 = int_to_ptr.vmem [resolvable:$true] %s549_s14 }
  0x1b   : > { %s294_s29 = scalar_lea.vmem %s1087_s0, %s634_s21  ;;  %417 = vmatpush.bf16.msra.mxu1 %v717_v5  ;;  %509 = vmatpush.bf16.msrb.mxu0 %v726_v15  ;;  %v723_v23 = vld [vmem:[#allocation2 + $0x20] sm:$0xff]  ;;  %v721_v35 = vld [vmem:[#allocation2 + $0x10] sm:$0xff]  ;;  %v720_v36 = vld [vmem:[#allocation2 + $0x8] sm:$0xff]  ;;  %s537_s16 = scalar_lea.sflag [#allocation4], %s287_s19 }
  0x1c   : > { %v298_v1 = vld [vmem:[%s294_s29] sm:$0xff]  ;;  %v299_v2 = vld [vmem:[%s294_s29 + $0x8] sm:$0xff]  ;;  %740 = vmatpush.bf16.msra.mxu3 %v717_v5  ;;  %v300_v8 = vld [vmem:[%s294_s29 + $0x10] sm:$0xff]  ;;  %s862_s21 = scalar_lea.hbm %s1094_s7, 32 }
  0x1d   : > { %v302_v3 = vpack.c.bf16 %v299_v2, %v298_v1  ;;  %v301_v9 = vld [vmem:[%s294_s29 + $0x18] sm:$0xff]  ;;  %v719_v37 = vld [vmem:[#allocation2] sm:$0xff]  ;;  %s548_s29 = scalar_lea.hbm %s1094_s7, %s727_s8 }
  0x1e   : > { %v303_v10 = vpack.c.bf16 %v301_v9, %v300_v8  ;;  %748 = vmatpush.bf16.msra.mxu2 %v725_v17  ;;  %v810_v39 = vld [vmem:[%s1091_s4] ss:$0 sm:$0xff]  ;;  %s551_s15 = sshll.u32 %s548_s29, 4  ;;  %s552_s15 = int_to_ptr.hbm [resolvable:$true] %s551_s15 }
  0x1f   : > { %639 = vmatmul.msk.bf16.vlgmr.msra.gmra.mxu0 %vm316_vm0, %v302_v3  ;;  %418 = vmatpush.bf16.msra.mxu1 %v716_v6  ;;  %v811_v54 = vld [vmem:[%s1093_s6] ss:$0 sm:$0xff]  ;;  %s856_s17 = sshra.s32 %s552_s15, 4  ;;  %s857_s17 = int_to_ptr.hbm [resolvable:$true] %s856_s17 }
  0x20   : > { %741 = vmatpush.bf16.msra.mxu3 %v716_v6  ;;  %510 = vmatpush.bf16.msrb.mxu0 %v725_v17  ;;  %s858_s18 = scalar_lea.hbm %s857_s17, 16  ;;  %p863_p3 = scmp.lt.s32.totalorder %s857_s17, %s1094_s7 }
  0x21   : > { %p859_p0 = scmp.ne.s32.totalorder %s857_s17, %s858_s18  ;;  %p864_p4 = scmp.lt.s32.totalorder %s862_s21, %s858_s18 }
  0x22   : > { %749 = vmatpush.bf16.msra.mxu2 %v724_v19 }
  0x23   : > { %419 = vmatpush.bf16.msra.mxu1 %v715_v7  ;;  %p860_p1 = pnand %p859_p0, %p993_p5  ;;  %p865_p7 = por %p864_p4, %p863_p3 }
  0x24   : > { %742 = vmatpush.bf16.msra.mxu3 %v715_v7  ;;  %511 = vmatpush.bf16.msrb.mxu0 %v724_v19 }
  0x25   : > { %p861_p2 = pneg %p860_p1 }
  0x26   : > { %750 = vmatpush.bf16.msra.mxu2 %v723_v23 }
  0x27   : > { %420 = vmatpush.bf16.msra.mxu1 %v714_v11  ;;  %p866_p8 = pnand %p865_p7, %p861_p2 }
  0x28   : > { %743 = vmatpush.bf16.msra.mxu3 %v714_v11  ;;  %512 = vmatpush.bf16.msrb.mxu0 %v723_v23 }
  0x2a   : > { %751 = vmatpush.bf16.msra.mxu2 %v722_v34 }
  0x2b   : > { %421 = vmatpush.bf16.msra.mxu1 %v713_v12 }
  0x2c   : > { %744 = vmatpush.bf16.msra.mxu3 %v713_v12  ;;  %513 = vmatpush.bf16.msrb.mxu0 %v722_v34 }
  0x2e   : > { %752 = vmatpush.bf16.msra.mxu2 %v721_v35 }
  0x2f   : > { %640 = vmatmul.msk.bf16.gmra.mxu0 %vm316_vm0, %v303_v10  ;;  %422 = vmatpush.bf16.msra.mxu1 %v712_v13 }
  0x30   : > { %745 = vmatpush.bf16.msra.mxu3 %v712_v13  ;;  %514 = vmatpush.bf16.msrb.mxu0 %v721_v35 }
  0x32   : > { %753 = vmatpush.bf16.msra.mxu2 %v720_v36 }
  0x33   : > { %423 = vmatpush.bf16.msra.mxu1 %v711_v14 }
  0x34   : > { %746 = vmatpush.bf16.msra.mxu3 %v711_v14  ;;  %515 = vmatpush.bf16.msrb.mxu0 %v720_v36 }
  0x36   : > { %754 = vmatpush.bf16.msra.mxu2 %v719_v37 }
  0x38   : > { %516 = vmatpush.bf16.msrb.mxu0 %v719_v37 }
  0x9c   : > { %v332_v16 = vpop.f32.mrf.mxu0 }
  0x9d   : > { %v333_v20 = vadd.f32 %v809_v18, %v332_v16 }
  0x9f   : > { %v342_v24 = vmax.f32 %v333_v20, 0.0 }
  0xa4   : > { %v334_v21 = vpop.f32.mrf.mxu0 }
  0xa5   : > { %v335_v22 = vadd.f32 %v809_v18, %v334_v21 }
  0xa7   : > { %v343_v25 = vmax.f32 %v335_v22, 0.0 }
  0xa9   : > { %v346_v26 = vpack.c.bf16 %v343_v25, %v342_v24 }
  0xab   : > { %424 = vmatmul.bf16.vlgmr.msra.gmra.mxu1 %v346_v26 }
  0xac   : > { %v337_v27 = vpop.f32.mrf.mxu0 }
  0xad   : > { %v338_v28 = vadd.f32 %v809_v18, %v337_v27 }
  0xaf   : > { %v344_v31 = vmax.f32 %v338_v28, 0.0 }
  0xb4   : > { %v339_v29 = vpop.f32.mrf.mxu0 }
  0xb5   : > { %v340_v30 = vadd.f32 %v809_v18, %v339_v29 }
  0xb7   : > { %v345_v32 = vmax.f32 %v340_v30, 0.0 }
  0xb9   : > { %v347_v33 = vpack.c.bf16 %v345_v32, %v344_v31 }
  0xbb   : > { %429 = vmatmul.bf16.vlgmr.msra.gmra.mxu3 %v347_v33 }
 0x128   : > { %v425_v38 = vpop.f32.mrf.mxu1 }
 0x129   : > { %v426_v40 = vadd.f32 %v810_v39, %v425_v38 }
 0x12b   : > { %v435_v43 = vmax.f32 %v426_v40, 0.0 }
 0x130   : > { %v427_v41 = vpop.f32.mrf.mxu1 }
 0x131   : > { %v428_v42 = vadd.f32 %v810_v39, %v427_v41 }
 0x133   : > { %v436_v44 = vmax.f32 %v428_v42, 0.0 }
 0x135   : > { %v439_v45 = vpack.c.bf16 %v436_v44, %v435_v43 }
 0x137   : > { %517 = vmatmul.bf16.vlgmr.msrb.gmra.mxu0 %v439_v45 }
 0x13e   : > { %v430_v46 = vpop.f32.mrf.mxu3 }
 0x13f   : > { %v431_v47 = vadd.f32 %v810_v39, %v430_v46 }
 0x141   : > { %v437_v50 = vmax.f32 %v431_v47, 0.0 }
 0x146   : > { %v432_v48 = vpop.f32.mrf.mxu3 }
 0x147   : > { %v433_v49 = vadd.f32 %v810_v39, %v432_v48 }
 0x149   : > { %v438_v51 = vmax.f32 %v433_v49, 0.0 }
 0x14b   : > { %v440_v52 = vpack.c.bf16 %v438_v51, %v437_v50 }
 0x14d   : > { %522 = vmatmul.bf16.vlgmr.msra.gmra.mxu2 %v440_v52 }
 0x1b4   : > { %v518_v53 = vpop.f32.mrf.mxu0 }
 0x1b5   : > { %v519_v56 = vadd.f32 %v811_v54, %v518_v53 }
 0x1bc   : > { %v520_v55 = vpop.f32.mrf.mxu0 }
 0x1bd   : > { %v521_v57 = vadd.f32 %v811_v54, %v520_v55 }
 0x1bf   : > { %v731_v58 = vpack.c.bf16 %v521_v57, %v519_v56 }
 0x1c1   : > { %732 = vst [vmem:[%s289_s23] sm:$0xff] %v731_v58  }
 0x1d0   : > { %v523_v59 = vpop.f32.mrf.mxu2 }
 0x1d1   : > { %v524_v61 = vadd.f32 %v811_v54, %v523_v59 }
 0x1d8   : > { %v525_v60 = vpop.f32.mrf.mxu2 }
 0x1d9   : > { %v526_v62 = vadd.f32 %v811_v54, %v525_v60 }
 0x1db   : > { %v736_v63 = vpack.c.bf16 %v526_v62, %v524_v61 }
 0x1dd   : > { %738 = vst [vmem:[%s289_s23 + $0x8] sm:$0xff] %v736_v63  }
 0x1de   : > { %869 = shalt.err (!%p866_p8)
}
 0x1df   : > { %s913_s19 = smov 64   ;;  %s914_s23 = smov 4  }
 0x1e0   : > { %759 = dma.vmem_to_hbm [thread:$0]  (%p993_p5), %s550_s14, 256, %s552_s15, %s537_s16, %s913_s19, %s913_s19, %s914_s23  }
 0x1e1 PF: > { %p771_p9 = scmp.ge.s32.totalorder %s908_s27, 2  ;;  %s566_s9 = sand.u32 1, %s896_s24  }
 0x1e2   : > { %s567_s13 = scalar_lea.sflag [#allocation4], %s566_s9 }
 0x1e3   : > { %p766_p10 = pnand %p771_p9, %p997_p6 }
 0x1e5   : > { %p767_p11 = pneg %p766_p10 }
 0x1e7   : > { %891 = dma.done.wait (%p767_p11), %s567_s13, 256  }
 0x1e8   : > { %893 = vsyncadd (%p767_p11), %s567_s13, 4294967040  ;;  %p18_p12 = scmp.ge.s32.totalorder %s980_s30, 4   ;;  %s1097_s24 = smov %s900_s25 }
 0x1e9   : > { %s1098_s25 = smov %s904_s26  ;;  %s1099_s26 = smov %s991_s10 }
 0x1ea   : > { %s1100_s27 = smov %s980_s30  ;;  %20 = sbr.rel (!%p18_p12) target bundleno = 4 (0x4), region = 88 }
 0x1ef   :  { %573 = vsyncpa [#allocation3], 1 }
 0x1f0   :  { %575 = vsyncpa [#allocation3 + $0x1], 1 }
 0x1f1   :  { %576 = vsyncpa [#allocation4], 1 }
 0x1f2   :  { %578 = vsyncpa [#allocation4 + $0x1], 1 }

</bundles_post_ra>
